<compile_context>
chip_gen: v7x
topology: tpu7x:2x2x1
jax: 0.10.0
libtpu: 0.0.40
codegen_flags: <defaults>
</compile_context>

<pallas_src>
import math

import jax
import jax.numpy as jnp
from jax.experimental import pallas as pl
from jax.experimental.pallas import tpu as pltpu

# ---- model hyperparameters (small, consistent with the module) -------------
BATCH = 2
SEQ = 8
HIDDEN = 32
INTERMEDIATE = 64
N_HEADS = 2
HEAD_DIM = HIDDEN // N_HEADS
LN_EPS = 1e-12
LANES = 128  # lane width used for the packed bias/LN-vector slab


def _layernorm(x, gamma, beta, eps):
    mean = jnp.mean(x, axis=-1, keepdims=True)
    var = jnp.mean((x - mean) ** 2, axis=-1, keepdims=True)
    return (x - mean) * jax.lax.rsqrt(var + eps) * gamma + beta


def _gelu_erf(x):
    # matches FeedForward.gelu: x * 0.5 * (1 + erf(x / sqrt(2)))
    return x * 0.5 * (1.0 + jax.lax.erf(x / math.sqrt(2.0)))


def transformer_layer_kernel(x_ref, mask_ref, w_all_ref, w2_ref, vec_ref, o_ref):
    B, S, H = x_ref.shape
    BS = B * S
    I = w2_ref.shape[0]
    H3 = 3 * H

    x = x_ref[...].reshape(BS, H)      # leading-dim collapse (no relayout)
    mask = mask_ref[...]               # (B, S, S) additive mask

    # --- packed parameters: single loads, static in-kernel slices -------------
    w_all = w_all_ref[...]             # (H, 3H | H | I)
    wqkv = w_all[:, :H3]               # 1/sqrt(head_dim) pre-folded into Q cols
    wo = w_all[:, H3:H3 + H]
    w1 = w_all[:, H3 + H:H3 + H + I]
    w2 = w2_ref[...]

    vec = vec_ref[...]                 # (8, 128) lane-padded vectors
    bqkv = vec[0:1, :H3]
    bo = vec[1:2, :H]
    g_attn = vec[2:3, :H]
    b_attn = vec[3:4, :H]
    bf1 = vec[4:5, :I]
    bf2 = vec[5:6, :H]
    g_out = vec[6:7, :H]
    b_out = vec[7:8, :H]

    # --- fused QKV projection: one MXU push with N = 3H lanes ----------------
    qkv = jnp.dot(x, wqkv, preferred_element_type=jnp.float32) + bqkv

    # --- multi-head self-attention (heads statically unrolled) ---------------
    # Output projection accumulated per head: attn += ctx_h @ W_O[rows_h, :]
    # (no cross-lane concatenation of head contexts).
    attn = jnp.broadcast_to(bo, (BS, H))
    for h in range(N_HEADS):
        lo = h * HEAD_DIM
        qh = qkv[:, lo:lo + HEAD_DIM].reshape(B, S, HEAD_DIM)
        kh = qkv[:, H + lo:H + lo + HEAD_DIM].reshape(B, S, HEAD_DIM)
        vh = qkv[:, 2 * H + lo:2 * H + lo + HEAD_DIM].reshape(B, S, HEAD_DIM)

        s = jnp.einsum('bqd,bkd->bqk', qh, kh,
                       preferred_element_type=jnp.float32) + mask
        m = jnp.max(s, axis=-1, keepdims=True)
        e = jnp.exp(s - m)
        # attn_dropout: identity (inference). Exact reciprocal keeps 1e-4
        # parity with the reference softmax (approx=True is ~2e-4 off).
        p = e * pl.reciprocal(jnp.sum(e, axis=-1, keepdims=True), approx=False)
        ctx_h = jnp.einsum('bqk,bkd->bqd', p, vh,
                           preferred_element_type=jnp.float32)       # (B, S, hd)
        attn = attn + jnp.dot(ctx_h.reshape(BS, HEAD_DIM),
                              wo[lo:lo + HEAD_DIM, :],
                              preferred_element_type=jnp.float32)

    # out_dropout: identity (inference)
    attn_out = _layernorm(attn + x, g_attn, b_attn, LN_EPS)

    # --- feed-forward (exact-erf GELU, matches FeedForward.gelu) -------------
    h1 = jnp.dot(attn_out, w1, preferred_element_type=jnp.float32) + bf1
    h1 = _gelu_erf(h1)
    h2 = jnp.dot(h1, w2, preferred_element_type=jnp.float32) + bf2
    # hidden_dropout: identity (inference)
    out = _layernorm(h2 + attn_out, g_out, b_out, LN_EPS)

    o_ref[...] = out.astype(o_ref.dtype)          # (B*S, H), reshaped in wrapper


def transformer_layer(x, mask, params):
    """x: (B, S, H) f32; mask: additive attention mask (B, 1, S, S)."""
    (wq, bq, wk, bk, wv, bv, wo, bo, ga, ba, w1, bf1, w2, bf2, go, bo2) = params
    B, S, H = x.shape
    I = w1.shape[1]

    # ---- host-side operand packing: 14 tiny operand DMAs -> 5 ---------------
    scale = 1.0 / math.sqrt(H // N_HEADS)
    # Fold the attention scale into Q weight/bias columns; pack every H-row
    # weight matrix into one lane-wise block: [ Wq*s | Wk | Wv | Wo | Wff1 ].
    w_all = jnp.concatenate([wq * scale, wk, wv, wo, w1], axis=1)   # (H, 5H + I)

    def lane_row(v):                                                # pad to 128 lanes
        return jnp.pad(v, ((0, 0), (0, LANES - v.shape[1])))

    vec = jnp.concatenate([
        lane_row(jnp.concatenate([bq * scale, bk, bv], axis=1)),    # row 0: bqkv
        lane_row(bo), lane_row(ga), lane_row(ba),                   # rows 1-3
        lane_row(bf1), lane_row(bf2), lane_row(go), lane_row(bo2),  # rows 4-7
    ], axis=0)                                                      # (8, 128)

    mask3 = mask[:, 0]                                              # (B, S, S)

    operands = (x, mask3, w_all, w2, vec)
    vmem = pl.BlockSpec(memory_space=pltpu.MemorySpace.VMEM)

    out_flat = pl.pallas_call(
        transformer_layer_kernel,
        out_shape=jax.ShapeDtypeStruct((B * S, H), jnp.float32),
        in_specs=[vmem] * len(operands),
        out_specs=vmem,
    )(*operands)
    # Row-major reshape back to (B, S, H): layout-preserving (free) in XLA.
    return out_flat.reshape(B, S, H)


# ---- pure-JAX reference for correctness checking ----------------------------
def reference(x, mask, params):
    (wq, bq, wk, bk, wv, bv, wo, bo, ga, ba, w1, bf1, w2, bf2, go, bo2) = params

    def ln(t, g, b):
        mu = t.mean(-1, keepdims=True)
        var = ((t - mu) ** 2).mean(-1, keepdims=True)
        return (t - mu) / jnp.sqrt(var + LN_EPS) * g + b

    B, S, H = x.shape
    q = x @ wq + bq
    k = x @ wk + bk
    v = x @ wv + bv

    def split(t):
        return t.reshape(B, S, N_HEADS, HEAD_DIM).transpose(0, 2, 1, 3)

    qh, kh, vh = split(q), split(k), split(v)
    scores = jnp.einsum('bhqd,bhkd->bhqk', qh, kh) / math.sqrt(HEAD_DIM) + mask
    probs = jax.nn.softmax(scores, axis=-1)
    ctx = jnp.einsum('bhqk,bhkd->bhqd', probs, vh).transpose(0, 2, 1, 3).reshape(B, S, H)
    attn = ctx @ wo + bo
    a = ln(attn + x, ga, ba)
    h = a @ w1 + bf1
    h = h * 0.5 * (1.0 + jax.lax.erf(h / math.sqrt(2.0)))
    h = h @ w2 + bf2
    return ln(h + a, go, bo2)


def init_params(key):
    ks = jax.random.split(key, 10)
    s = 0.05
    wq = jax.random.normal(ks[0], (HIDDEN, HIDDEN), jnp.float32) * s
    bq = jax.random.normal(ks[1], (1, HIDDEN), jnp.float32) * s
    wk = jax.random.normal(ks[2], (HIDDEN, HIDDEN), jnp.float32) * s
    bk = jax.random.normal(ks[3], (1, HIDDEN), jnp.float32) * s
    wv = jax.random.normal(ks[4], (HIDDEN, HIDDEN), jnp.float32) * s
    bv = jax.random.normal(ks[5], (1, HIDDEN), jnp.float32) * s
    wo = jax.random.normal(ks[6], (HIDDEN, HIDDEN), jnp.float32) * s
    bo = jax.random.normal(ks[7], (1, HIDDEN), jnp.float32) * s
    g_attn = jnp.ones((1, HIDDEN), jnp.float32)
    b_attn = jnp.zeros((1, HIDDEN), jnp.float32)
    w1 = jax.random.normal(ks[8], (HIDDEN, INTERMEDIATE), jnp.float32) * s
    bf1 = jnp.zeros((1, INTERMEDIATE), jnp.float32)
    w2 = jax.random.normal(ks[9], (INTERMEDIATE, HIDDEN), jnp.float32) * s
    bf2 = jnp.zeros((1, HIDDEN), jnp.float32)
    g_out = jnp.ones((1, HIDDEN), jnp.float32)
    b_out = jnp.zeros((1, HIDDEN), jnp.float32)
    return (wq, bq, wk, bk, wv, bv, wo, bo, g_attn, b_attn,
            w1, bf1, w2, bf2, g_out, b_out)


if __name__ == "__main__":
    key = jax.random.PRNGKey(0)
    kx, kp = jax.random.split(key, 2)

    x = jax.random.normal(kx, (BATCH, SEQ, HIDDEN), jnp.float32)

    # additive attention mask [B, 1, S, S]: second sequence has 3 padded tokens
    valid_len = jnp.array([SEQ, SEQ - 3])
    pos = jnp.arange(SEQ)
    key_valid = (pos[None, :] < valid_len[:, None]).astype(jnp.float32)  # (B, S)
    mask = jnp.zeros((BATCH, 1, SEQ, SEQ), jnp.float32) \
        + (1.0 - key_valid)[:, None, None, :] * -10000.0

    params = init_params(kp)

    out = transformer_layer(x, mask, params)
    out = jax.block_until_ready(out)

    ref = reference(x, mask, params)
    assert out.shape == (BATCH, SEQ, HIDDEN)
    assert jnp.allclose(out, ref, atol=1e-4, rtol=1e-4), \
        f"max abs err {jnp.max(jnp.abs(out - ref))}"

    print("KERNEL_OK")
</pallas_src>

<mosaic_0001>
module attributes {stable_mosaic.version = 11 : i64} {
  func.func @transformer_layer_kernel(%arg0: memref<2x8x32xf32, #tpu.memory_space<vmem>>, %arg1: memref<2x8x8xf32, #tpu.memory_space<vmem>>, %arg2: memref<32x192xf32, #tpu.memory_space<vmem>>, %arg3: memref<64x32xf32, #tpu.memory_space<vmem>>, %arg4: memref<8x128xf32, #tpu.memory_space<vmem>>, %arg5: memref<16x32xf32, #tpu.memory_space<vmem>>) attributes {dimension_semantics = [], scalar_prefetch = 0 : i64, scratch_operands = 0 : i64, tpu.core_type = #tpu.core_type<tc>} {
    %c0 = arith.constant 0 : index
    %c0_0 = arith.constant 0 : index
    %c0_1 = arith.constant 0 : index
    %0 = vector.load %arg0[%c0, %c0_0, %c0_1] : memref<2x8x32xf32, #tpu.memory_space<vmem>>, vector<2x8x32xf32>
    %1 = vector.shape_cast %0 : vector<2x8x32xf32> to vector<16x32xf32>
    %c0_2 = arith.constant 0 : index
    %c0_3 = arith.constant 0 : index
    %c0_4 = arith.constant 0 : index
    %2 = vector.load %arg1[%c0_2, %c0_3, %c0_4] : memref<2x8x8xf32, #tpu.memory_space<vmem>>, vector<2x8x8xf32>
    %c0_5 = arith.constant 0 : index
    %c0_6 = arith.constant 0 : index
    %3 = vector.load %arg2[%c0_5, %c0_6] : memref<32x192xf32, #tpu.memory_space<vmem>>, vector<32x192xf32>
    %4 = vector.extract_strided_slice %3 {offsets = [0, 0], sizes = [32, 96], strides = [1, 1]} : vector<32x192xf32> to vector<32x96xf32>
    %5 = vector.extract_strided_slice %3 {offsets = [0, 96], sizes = [32, 32], strides = [1, 1]} : vector<32x192xf32> to vector<32x32xf32>
    %6 = vector.extract_strided_slice %3 {offsets = [0, 128], sizes = [32, 64], strides = [1, 1]} : vector<32x192xf32> to vector<32x64xf32>
    %c0_7 = arith.constant 0 : index
    %c0_8 = arith.constant 0 : index
    %7 = vector.load %arg3[%c0_7, %c0_8] : memref<64x32xf32, #tpu.memory_space<vmem>>, vector<64x32xf32>
    %c0_9 = arith.constant 0 : index
    %c0_10 = arith.constant 0 : index
    %8 = vector.load %arg4[%c0_9, %c0_10] : memref<8x128xf32, #tpu.memory_space<vmem>>, vector<8x128xf32>
    %9 = vector.extract_strided_slice %8 {offsets = [0, 0], sizes = [1, 96], strides = [1, 1]} : vector<8x128xf32> to vector<1x96xf32>
    %10 = vector.extract_strided_slice %8 {offsets = [1, 0], sizes = [1, 32], strides = [1, 1]} : vector<8x128xf32> to vector<1x32xf32>
    %11 = vector.extract_strided_slice %8 {offsets = [2, 0], sizes = [1, 32], strides = [1, 1]} : vector<8x128xf32> to vector<1x32xf32>
    %12 = vector.extract_strided_slice %8 {offsets = [3, 0], sizes = [1, 32], strides = [1, 1]} : vector<8x128xf32> to vector<1x32xf32>
    %13 = vector.extract_strided_slice %8 {offsets = [4, 0], sizes = [1, 64], strides = [1, 1]} : vector<8x128xf32> to vector<1x64xf32>
    %14 = vector.extract_strided_slice %8 {offsets = [5, 0], sizes = [1, 32], strides = [1, 1]} : vector<8x128xf32> to vector<1x32xf32>
    %15 = vector.extract_strided_slice %8 {offsets = [6, 0], sizes = [1, 32], strides = [1, 1]} : vector<8x128xf32> to vector<1x32xf32>
    %16 = vector.extract_strided_slice %8 {offsets = [7, 0], sizes = [1, 32], strides = [1, 1]} : vector<8x128xf32> to vector<1x32xf32>
    %cst = arith.constant dense<0.000000e+00> : vector<16x96xf32>
    %17 = tpu.matmul %1, %4, %cst {dimension_numbers = #tpu.dot_dimension_numbers<[1], [0], [0], [1], [0, 0, 1, 1], [], []>} : vector<16x32xf32>, vector<32x96xf32>, vector<16x96xf32> -> vector<16x96xf32>
    %18 = vector.broadcast %9 : vector<1x96xf32> to vector<16x96xf32>
    %19 = arith.addf %17, %18 : vector<16x96xf32>
    %20 = vector.shape_cast %10 : vector<1x32xf32> to vector<1x32xf32>
    %21 = vector.broadcast %20 : vector<1x32xf32> to vector<16x32xf32>
    %22 = vector.extract_strided_slice %19 {offsets = [0, 0], sizes = [16, 16], strides = [1, 1]} : vector<16x96xf32> to vector<16x16xf32>
    %23 = vector.shape_cast %22 : vector<16x16xf32> to vector<2x8x16xf32>
    %24 = vector.extract_strided_slice %19 {offsets = [0, 32], sizes = [16, 16], strides = [1, 1]} : vector<16x96xf32> to vector<16x16xf32>
    %25 = vector.shape_cast %24 : vector<16x16xf32> to vector<2x8x16xf32>
    %26 = vector.extract_strided_slice %19 {offsets = [0, 64], sizes = [16, 16], strides = [1, 1]} : vector<16x96xf32> to vector<16x16xf32>
    %27 = vector.shape_cast %26 : vector<16x16xf32> to vector<2x8x16xf32>
    "tpu.trace_start"() <{level = 10 : i32, message = "bqd,bkd->bqk"}> : () -> ()
    %cst_11 = arith.constant dense<0.000000e+00> : vector<2x8x8xf32>
    %28 = tpu.matmul %23, %25, %cst_11 {dimension_numbers = #tpu.dot_dimension_numbers<[2], [2], [1], [1], [0, 0, 0, 1, 1, 1], [0], [0]>} : vector<2x8x16xf32>, vector<2x8x16xf32>, vector<2x8x8xf32> -> vector<2x8x8xf32>
    "tpu.trace_stop"() : () -> ()
    %29 = arith.addf %28, %2 : vector<2x8x8xf32>
    %cst_12 = arith.constant dense<0xFF800000> : vector<2x8xf32>
    %30 = vector.multi_reduction <maximumf>, %29, %cst_12 [2] : vector<2x8x8xf32> to vector<2x8xf32>
    %31 = vector.shape_cast %30 : vector<2x8xf32> to vector<2x8x1xf32>
    %32 = vector.broadcast %31 : vector<2x8x1xf32> to vector<2x8x8xf32>
    %33 = arith.subf %29, %32 : vector<2x8x8xf32>
    %34 = math.exp %33 : vector<2x8x8xf32>
    %cst_13 = arith.constant dense<0.000000e+00> : vector<2x8xf32>
    %35 = vector.multi_reduction <add>, %34, %cst_13 [2] : vector<2x8x8xf32> to vector<2x8xf32>
    %36 = vector.shape_cast %35 : vector<2x8xf32> to vector<2x8x1xf32>
    %37 = tpu.reciprocal %36 : vector<2x8x1xf32> -> vector<2x8x1xf32>
    %38 = vector.broadcast %37 : vector<2x8x1xf32> to vector<2x8x8xf32>
    %39 = arith.mulf %34, %38 : vector<2x8x8xf32>
    "tpu.trace_start"() <{level = 10 : i32, message = "bqk,bkd->bqd"}> : () -> ()
    %cst_14 = arith.constant dense<0.000000e+00> : vector<2x8x16xf32>
    %40 = tpu.matmul %39, %27, %cst_14 {dimension_numbers = #tpu.dot_dimension_numbers<[2], [1], [1], [2], [0, 0, 0, 1, 1, 2], [0], [0]>} : vector<2x8x8xf32>, vector<2x8x16xf32>, vector<2x8x16xf32> -> vector<2x8x16xf32>
    "tpu.trace_stop"() : () -> ()
    %41 = vector.shape_cast %40 : vector<2x8x16xf32> to vector<16x16xf32>
    %42 = vector.extract_strided_slice %5 {offsets = [0, 0], sizes = [16, 32], strides = [1, 1]} : vector<32x32xf32> to vector<16x32xf32>
    %cst_15 = arith.constant dense<0.000000e+00> : vector<16x32xf32>
    %43 = tpu.matmul %41, %42, %cst_15 {dimension_numbers = #tpu.dot_dimension_numbers<[1], [0], [0], [1], [0, 0, 1, 1], [], []>} : vector<16x16xf32>, vector<16x32xf32>, vector<16x32xf32> -> vector<16x32xf32>
    %44 = arith.addf %21, %43 : vector<16x32xf32>
    %45 = vector.extract_strided_slice %19 {offsets = [0, 16], sizes = [16, 16], strides = [1, 1]} : vector<16x96xf32> to vector<16x16xf32>
    %46 = vector.shape_cast %45 : vector<16x16xf32> to vector<2x8x16xf32>
    %47 = vector.extract_strided_slice %19 {offsets = [0, 48], sizes = [16, 16], strides = [1, 1]} : vector<16x96xf32> to vector<16x16xf32>
    %48 = vector.shape_cast %47 : vector<16x16xf32> to vector<2x8x16xf32>
    %49 = vector.extract_strided_slice %19 {offsets = [0, 80], sizes = [16, 16], strides = [1, 1]} : vector<16x96xf32> to vector<16x16xf32>
    %50 = vector.shape_cast %49 : vector<16x16xf32> to vector<2x8x16xf32>
    "tpu.trace_start"() <{level = 10 : i32, message = "bqd,bkd->bqk"}> : () -> ()
    %cst_16 = arith.constant dense<0.000000e+00> : vector<2x8x8xf32>
    %51 = tpu.matmul %46, %48, %cst_16 {dimension_numbers = #tpu.dot_dimension_numbers<[2], [2], [1], [1], [0, 0, 0, 1, 1, 1], [0], [0]>} : vector<2x8x16xf32>, vector<2x8x16xf32>, vector<2x8x8xf32> -> vector<2x8x8xf32>
    "tpu.trace_stop"() : () -> ()
    %52 = arith.addf %51, %2 : vector<2x8x8xf32>
    %cst_17 = arith.constant dense<0xFF800000> : vector<2x8xf32>
    %53 = vector.multi_reduction <maximumf>, %52, %cst_17 [2] : vector<2x8x8xf32> to vector<2x8xf32>
    %54 = vector.shape_cast %53 : vector<2x8xf32> to vector<2x8x1xf32>
    %55 = vector.broadcast %54 : vector<2x8x1xf32> to vector<2x8x8xf32>
    %56 = arith.subf %52, %55 : vector<2x8x8xf32>
    %57 = math.exp %56 : vector<2x8x8xf32>
    %cst_18 = arith.constant dense<0.000000e+00> : vector<2x8xf32>
    %58 = vector.multi_reduction <add>, %57, %cst_18 [2] : vector<2x8x8xf32> to vector<2x8xf32>
    %59 = vector.shape_cast %58 : vector<2x8xf32> to vector<2x8x1xf32>
    %60 = tpu.reciprocal %59 : vector<2x8x1xf32> -> vector<2x8x1xf32>
    %61 = vector.broadcast %60 : vector<2x8x1xf32> to vector<2x8x8xf32>
    %62 = arith.mulf %57, %61 : vector<2x8x8xf32>
    "tpu.trace_start"() <{level = 10 : i32, message = "bqk,bkd->bqd"}> : () -> ()
    %cst_19 = arith.constant dense<0.000000e+00> : vector<2x8x16xf32>
    %63 = tpu.matmul %62, %50, %cst_19 {dimension_numbers = #tpu.dot_dimension_numbers<[2], [1], [1], [2], [0, 0, 0, 1, 1, 2], [0], [0]>} : vector<2x8x8xf32>, vector<2x8x16xf32>, vector<2x8x16xf32> -> vector<2x8x16xf32>
    "tpu.trace_stop"() : () -> ()
    %64 = vector.shape_cast %63 : vector<2x8x16xf32> to vector<16x16xf32>
    %65 = vector.extract_strided_slice %5 {offsets = [16, 0], sizes = [16, 32], strides = [1, 1]} : vector<32x32xf32> to vector<16x32xf32>
    %cst_20 = arith.constant dense<0.000000e+00> : vector<16x32xf32>
    %66 = tpu.matmul %64, %65, %cst_20 {dimension_numbers = #tpu.dot_dimension_numbers<[1], [0], [0], [1], [0, 0, 1, 1], [], []>} : vector<16x16xf32>, vector<16x32xf32>, vector<16x32xf32> -> vector<16x32xf32>
    %67 = arith.addf %44, %66 : vector<16x32xf32>
    %68 = arith.addf %67, %1 : vector<16x32xf32>
    %cst_21 = arith.constant dense<0.000000e+00> : vector<16xf32>
    %69 = vector.multi_reduction <add>, %68, %cst_21 [1] : vector<16x32xf32> to vector<16xf32>
    %70 = vector.shape_cast %69 : vector<16xf32> to vector<16x1xf32>
    %cst_22 = arith.constant 3.200000e+01 : f32
    %71 = vector.broadcast %cst_22 : f32 to vector<16x1xf32>
    %72 = arith.divf %70, %71 : vector<16x1xf32>
    %73 = vector.broadcast %72 : vector<16x1xf32> to vector<16x32xf32>
    %74 = arith.subf %68, %73 : vector<16x32xf32>
    %75 = arith.mulf %74, %74 : vector<16x32xf32>
    %cst_23 = arith.constant dense<0.000000e+00> : vector<16xf32>
    %76 = vector.multi_reduction <add>, %75, %cst_23 [1] : vector<16x32xf32> to vector<16xf32>
    %77 = vector.shape_cast %76 : vector<16xf32> to vector<16x1xf32>
    %cst_24 = arith.constant 3.200000e+01 : f32
    %78 = vector.broadcast %cst_24 : f32 to vector<16x1xf32>
    %79 = arith.divf %77, %78 : vector<16x1xf32>
    %80 = vector.broadcast %72 : vector<16x1xf32> to vector<16x32xf32>
    %81 = arith.subf %68, %80 : vector<16x32xf32>
    %cst_25 = arith.constant 9.99999996E-13 : f32
    %82 = vector.broadcast %cst_25 : f32 to vector<16x1xf32>
    %83 = arith.addf %79, %82 : vector<16x1xf32>
    %84 = math.rsqrt %83 : vector<16x1xf32>
    %85 = vector.broadcast %84 : vector<16x1xf32> to vector<16x32xf32>
    %86 = arith.mulf %81, %85 : vector<16x32xf32>
    %87 = vector.broadcast %11 : vector<1x32xf32> to vector<16x32xf32>
    %88 = arith.mulf %86, %87 : vector<16x32xf32>
    %89 = vector.broadcast %12 : vector<1x32xf32> to vector<16x32xf32>
    %90 = arith.addf %88, %89 : vector<16x32xf32>
    %cst_26 = arith.constant dense<0.000000e+00> : vector<16x64xf32>
    %91 = tpu.matmul %90, %6, %cst_26 {dimension_numbers = #tpu.dot_dimension_numbers<[1], [0], [0], [1], [0, 0, 1, 1], [], []>} : vector<16x32xf32>, vector<32x64xf32>, vector<16x64xf32> -> vector<16x64xf32>
    %92 = vector.broadcast %13 : vector<1x64xf32> to vector<16x64xf32>
    %93 = arith.addf %91, %92 : vector<16x64xf32>
    %cst_27 = arith.constant 5.000000e-01 : f32
    %94 = vector.broadcast %cst_27 : f32 to vector<16x64xf32>
    %95 = arith.mulf %93, %94 : vector<16x64xf32>
    %cst_28 = arith.constant 1.41421354 : f32
    %96 = vector.broadcast %cst_28 : f32 to vector<16x64xf32>
    %97 = arith.divf %93, %96 : vector<16x64xf32>
    %98 = math.erf %97 : vector<16x64xf32>
    %cst_29 = arith.constant 1.000000e+00 : f32
    %99 = vector.broadcast %cst_29 : f32 to vector<16x64xf32>
    %100 = arith.addf %99, %98 : vector<16x64xf32>
    %101 = arith.mulf %95, %100 : vector<16x64xf32>
    %cst_30 = arith.constant dense<0.000000e+00> : vector<16x32xf32>
    %102 = tpu.matmul %101, %7, %cst_30 {dimension_numbers = #tpu.dot_dimension_numbers<[1], [0], [0], [1], [0, 0, 1, 1], [], []>} : vector<16x64xf32>, vector<64x32xf32>, vector<16x32xf32> -> vector<16x32xf32>
    %103 = vector.broadcast %14 : vector<1x32xf32> to vector<16x32xf32>
    %104 = arith.addf %102, %103 : vector<16x32xf32>
    %105 = arith.addf %104, %90 : vector<16x32xf32>
    %cst_31 = arith.constant dense<0.000000e+00> : vector<16xf32>
    %106 = vector.multi_reduction <add>, %105, %cst_31 [1] : vector<16x32xf32> to vector<16xf32>
    %107 = vector.shape_cast %106 : vector<16xf32> to vector<16x1xf32>
    %cst_32 = arith.constant 3.200000e+01 : f32
    %108 = vector.broadcast %cst_32 : f32 to vector<16x1xf32>
    %109 = arith.divf %107, %108 : vector<16x1xf32>
    %110 = vector.broadcast %109 : vector<16x1xf32> to vector<16x32xf32>
    %111 = arith.subf %105, %110 : vector<16x32xf32>
    %112 = arith.mulf %111, %111 : vector<16x32xf32>
    %cst_33 = arith.constant dense<0.000000e+00> : vector<16xf32>
    %113 = vector.multi_reduction <add>, %112, %cst_33 [1] : vector<16x32xf32> to vector<16xf32>
    %114 = vector.shape_cast %113 : vector<16xf32> to vector<16x1xf32>
    %cst_34 = arith.constant 3.200000e+01 : f32
    %115 = vector.broadcast %cst_34 : f32 to vector<16x1xf32>
    %116 = arith.divf %114, %115 : vector<16x1xf32>
    %117 = vector.broadcast %109 : vector<16x1xf32> to vector<16x32xf32>
    %118 = arith.subf %105, %117 : vector<16x32xf32>
    %cst_35 = arith.constant 9.99999996E-13 : f32
    %119 = vector.broadcast %cst_35 : f32 to vector<16x1xf32>
    %120 = arith.addf %116, %119 : vector<16x1xf32>
    %121 = math.rsqrt %120 : vector<16x1xf32>
    %122 = vector.broadcast %121 : vector<16x1xf32> to vector<16x32xf32>
    %123 = arith.mulf %118, %122 : vector<16x32xf32>
    %124 = vector.broadcast %15 : vector<1x32xf32> to vector<16x32xf32>
    %125 = arith.mulf %123, %124 : vector<16x32xf32>
    %126 = vector.broadcast %16 : vector<1x32xf32> to vector<16x32xf32>
    %127 = arith.addf %125, %126 : vector<16x32xf32>
    %c0_36 = arith.constant 0 : index
    %c0_37 = arith.constant 0 : index
    %128 = vector.load %arg5[%c0_36, %c0_37] : memref<16x32xf32, #tpu.memory_space<vmem>>, vector<16x32xf32>
    tpu.vector_store %arg5[%c0_36, %c0_37], %127 {strides = array<i32>} : memref<16x32xf32, #tpu.memory_space<vmem>>, vector<16x32xf32>,
    return
  }
}

</mosaic_0001>

<bundles_post_ra>
// kernel: tpu_custom_call.1
= control target key start
LH: loop header
LB: loop body
LE: loop exit
PB: predicated region body
PF: predicated region fallthrough
CT: control target
= control target key end

     0   :  { %vm46_vm0 = vcmask 261120   ;;  %s1786_s0 = inlined_call_operand.vmem [shape: f32[2,8,32], index: 0, kind: input, shape index: {}]   ;;  %s1787_s1 = inlined_call_operand.vmem [shape: f32[2,8,8], index: 1, kind: input, shape index: {}]   ;;  %s1788_s2 = inlined_call_operand.vmem [shape: f32[32,192], index: 2, kind: input, shape index: {}]   ;;  %s1789_s3 = inlined_call_operand.vmem [shape: f32[64,32], index: 3, kind: input, shape index: {}]   ;;  %s1790_s4 = inlined_call_operand.vmem [shape: f32[8,128], index: 4, kind: input, shape index: {}]   ;;  %s1791_s5 = inlined_call_operand.hbm [shape: f32[16,32], index: 5, kind: output, shape index: {}]  }
   0x1   :  { %v1579_v0 = vld [vmem:[%s1788_s2] sm:$0xff]  ;;  %v1584_v1 = vld [vmem:[%s1788_s2 + $0x10] sm:$0xff] }
   0x2   :  { %v1589_v2 = vld [vmem:[%s1788_s2 + $0x20] sm:$0xff]  ;;  %v1473_v3 = vpack.i.bf16 %v1584_v1, %v1579_v0  ;;  %v1418_v4 = vpack.c.bf16 %v1584_v1, %v1579_v0  ;;  %v1598_v5 = vld [vmem:[%s1788_s2 + $0x30] sm:$0xff] }
   0x3   :  { %v1603_v6 = vld [vmem:[%s1786_s0] sm:$0xff]  ;;  %v1422_v7 = vpack.c.bf16 %v1598_v5, %v1589_v2 }
   0x4   :  { %1331 = vmatprep.mubr.msk.f32.mxu1 %vm46_vm0, %v1603_v6 }
   0x5   :  { %10 = vsyncpa [#allocation3], 0  ;;  %1419 = vmatprep.subr.bf16.mxu1 %v1418_v4  ;;  %v1612_v8 = vld [vmem:[%s1786_s0 + $0x8] sm:$0xff]  ;;  %v1535_v9 = vmov 0.0   ;;  %v42_v10 = vlaneseq  ;;  %vm1536_vm1 = vmmov 0   ;;  %v1628_v13 = vld [vmem:[%s1790_s4] sm:$0xff] }
   0x6   :  { %1421 = vmatpush3.bf16.msra.mxu1 %v1418_v4  ;;  %1344 = vmatprep.subr.mxu0 %v1535_v9  ;;  %s1537_s6 = smov 96   ;;  %vm135_vm2 = vcmask 130048   ;;  %v1652_v21 = vld [vmem:[%s1787_s1] sm:$0xff]  ;;  %vm287_vm3 = vcmask 64512   ;;  %v1658_v25 = vld [vmem:[%s1787_s1 + $0x8] sm:$0xff]  ;;  %s1538_s10 = smov 64  }
   0x7   :  { %1423 = vmatprep.subr.bf16.mxu1 %v1422_v7  ;;  %v1618_v11 = vshrl.u32 %v42_v10, 7  ;;  %1346 = vmatprep.mubr.msk.f32.mxu0 %vm1536_vm1, %v1535_v9  ;;  %s1539_s1 = smov 80   ;;  %s1540_s11 = smov 32   ;;  %vm1115_vm4 = vcmask 523264  }
   0x8   :  { %s1541_s12 = smov 112   ;;  %s1542_s13 = smov 48  }
   0x9   :  { %v44_v12 = vsub.s32 0, %v1618_v11 }
   0xa   :  { %1425 = vmatpush3.bf16.msra.mxu1 %v1422_v7 }
   0xb   :  { %1334 = vmatprep.subr.mxu1 %v1535_v9  ;;  %v45_v14 = vrot.slane %v1628_v13, %v44_v12 }
   0xd   :  { %1332 = vmatmul.mubr.msk.f32.vlgmr.msra.gmra.mrb[0].mxu1 %vm46_vm0, %v1612_v8 }
   0xe   :  { %1336 = vmatprep.mubr.msk.f32.mxu1 %vm1536_vm1, %v1535_v9 }
  0xe0   :  { %v1333_v15 = vpop.f32.mrb[0].mxu1 }
  0xe1   :  { %v119_v16 = vpop.f32.mrb[1].mxu1  ;;  %v1634_v18 = vadd.f32 %v1333_v15, %v45_v14 }
  0xe2   :  { %v1631_v17 = vadd.f32 %v119_v16, %v45_v14 }
  0xe4   :  { %133 = vrot.lane.b32.xlu0 %v1631_v17, %s1537_s6 }
  0xe8   :  { %211 = vrot.lane.b32.xlu0 %v1634_v18, %s1537_s6 }
 0x156   :  { %v134_v19 = vpop.permute.xlu0 %133 }
 0x157   :  { %1335 = vmatpush3.xpose.msk.msra.mxu1 %vm135_vm2, %v134_v19 }
 0x158   :  { %1339 = vmatprep.subr.mxu1 %v1535_v9 }
 0x15a   :  { %1337 = vmatmul.mubr.msk.f32.vlgmr.msra.gmra.mrb[2].mxu1 %vm135_vm2, %v1631_v17  ;;  %v212_v20 = vpop.permute.xlu0 %211 }
 0x15b   :  { %1340 = vmatpush3.xpose.msk.msra.mxu1 %vm135_vm2, %v212_v20  ;;  %1341 = vmatprep.mubr.msk.f32.mxu1 %vm1536_vm1, %v1535_v9 }
 0x15c   :  { %1349 = vmatprep.subr.mxu1 %v1535_v9 }
 0x15e   :  { %1342 = vmatmul.mubr.msk.f32.vlgmr.msra.gmra.mrb[4].mxu1 %vm135_vm2, %v1634_v18 }
 0x15f   :  { %1351 = vmatprep.mubr.msk.f32.mxu1 %vm1536_vm1, %v1535_v9 }
 0x22d   :  { %v206_v22 = vpop.f32.mrb[2].mxu1 }
 0x22e   :  { %v207_v23 = vadd.f32 %v206_v22, %v1652_v21  ;;  %v1338_v24 = vpop.f32.mrb[3].mxu1 }
 0x230   :  { %v288_v26 = vsel %vm287_vm3, %v207_v23, -inf }
 0x231   :  { %289 = vmax.xlane.f32.xlu1 %v288_v26  ;;  %v283_v27 = vpop.f32.mrb[4].mxu1 }
 0x232   :  { %v284_v28 = vadd.f32 %v283_v27, %v1658_v25  ;;  %v1343_v29 = vpop.f32.mrb[5].mxu1 }
 0x234   :  { %v291_v30 = vsel %vm287_vm3, %v284_v28, -inf }
 0x235   :  { %292 = vmax.xlane.f32.xlu1 %v291_v30 }
 0x246   :  { %310 = vrot.lane.b32.xlu1 %v1631_v17, %s1538_s10 }
 0x2be   :  { %v290_v31 = vpop.xlane.xlu1 %289 }
 0x2bf   :  { %v294_v32 = vsub.f32 %v207_v23, %v290_v31 }
 0x2c1   :  { %v296_v33 = vmul.f32 1.442695, %v294_v32 }
 0x2c2   :  { %v293_v34 = vpop.xlane.xlu1 %292 }
 0x2c3   :  { %1483 = vpow2.f32 %v296_v33  ;;  %v295_v35 = vsub.f32 %v284_v28, %v293_v34 }
 0x2c5   :  { %v298_v36 = vmul.f32 1.442695, %v295_v35 }
 0x2c6   :  { %v311_v37 = vpop.permute.xlu1 %310 }
 0x2c7   :  { %1485 = vpow2.f32 %v298_v36  ;;  %1345 = vmatpush3.msra.mxu0 %v311_v37  ;;  %v130_v36 = vsub.s32 1, %v1618_v11 }
 0x2c9   :  { %v131_v37 = vrot.slane %v1628_v13, %v130_v36 }
 0x2cd   :  { %v1484_v38 = vpop.eup %1483 }
 0x2ce   :  { %v300_v39 = vsel %vm287_vm3, %v1484_v38, 0.0 }
 0x2cf   :  { %301 = vadd.xlane.f32.xlu0 %v300_v39 }
 0x2d1   :  { %v1486_v40 = vpop.eup %1485 }
 0x2d2   :  { %v303_v41 = vsel %vm287_vm3, %v1486_v40, 0.0 }
 0x2d3   :  { %304 = vadd.xlane.f32.xlu1 %v303_v41 }
 0x2e4   :  { %386 = vrot.lane.b32.xlu1 %v1634_v18, %s1538_s10 }
 0x2e5   :  { %633 = vrot.lane.b32.xlu0 %v1634_v18, %s1539_s1 }
 0x2e8   :  { %1474 = vrot.lane.b32.xlu1 %v1473_v3, %s1540_s11 }
 0x2ec   :  { %555 = vrot.lane.b32.xlu1 %v1631_v17, %s1539_s1 }
 0x2f0   :  { %553 = vrot.lane.b32.xlu1 %v1631_v17, %s1541_s12 }
 0x2f4   :  { %631 = vrot.lane.b32.xlu1 %v1634_v18, %s1541_s12 }
 0x35c   :  { %v302_v42 = vpop.xlane.xlu0 %301 }
 0x35d   :  { %1487 = vrcp.f32 %v302_v42 }
 0x360   :  { %v305_v43 = vpop.xlane.xlu1 %304  ;;  %v634_v58 = vpop.permute.xlu0 %633 }
 0x361   :  { %1489 = vrcp.f32 %v305_v43 }
 0x364   :  { %v387_v44 = vpop.permute.xlu1 %386 }
 0x365   :  { %1350 = vmatpush3.msra.mxu1 %v387_v44 }
 0x366   :  { %1361 = vmatprep.subr.mxu1 %v1535_v9 }
 0x367   :  { %v1488_v45 = vpop.eup %1487 }
 0x368   :  { %v1475_v46 = vpop.permute.xlu1 %1474  ;;  %v308_v47 = vmul.f32 %v1488_v45, %v1484_v38 }
 0x369   :  { %v1477_v48 = vunpack.i.h.bf16 %v1475_v46  ;;  %v1476_v49 = vunpack.i.l.bf16 %v1475_v46 }
 0x36a   :  { %1347 = vmatmul.mubr.msk.f32.vlgmr.msra.gmra.mrb[0].mxu0 %vm287_vm3, %v308_v47 }
 0x36b   :  { %v1490_v50 = vpop.eup %1489  ;;  %v1426_v51 = vpack.c.bf16 %v1477_v48, %v1476_v49 }
 0x36c   :  { %v309_v52 = vmul.f32 %v1490_v50, %v1486_v40  ;;  %v556_v53 = vpop.permute.xlu1 %555 }
 0x36d   :  { %1427 = vmatprep.subr.bf16.mxu0 %v1426_v51 }
 0x36e   :  { %1352 = vmatmul.mubr.msk.f32.vlgmr.msra.gmra.mrb[6].mxu1 %vm287_vm3, %v309_v52  ;;  %1429 = vmatpush3.bf16.msra.mxu0 %v1426_v51 }
 0x36f   :  { %1362 = vmatpush3.xpose.msk.msra.mxu1 %vm135_vm2, %v556_v53  ;;  %1363 = vmatprep.mubr.msk.f32.mxu1 %vm1536_vm1, %v1535_v9 }
 0x370   :  { %v554_v54 = vpop.permute.xlu1 %553  ;;  %1366 = vmatprep.subr.mxu0 %v1535_v9  ;;  %1371 = vmatprep.subr.mxu1 %v1535_v9 }
 0x372   :  { %1364 = vmatmul.mubr.msk.f32.vlgmr.msra.gmra.mrb[8].mxu1 %vm135_vm2, %v554_v54 }
 0x373   :  { %1373 = vmatprep.mubr.msk.f32.mxu1 %vm1536_vm1, %v1535_v9 }
 0x374   :  { %v632_v60 = vpop.permute.xlu1 %631 }
 0x43d   :  { %v382_v55 = vpop.f32.mrb[0].mxu0 }
 0x43e   :  { %v1348_v56 = vpop.f32.mrb[1].mxu0  ;;  %1358 = vmatprep.mubr.msk.f32.mxu0 %vm135_vm2, %v382_v55  ;;  %v28_v55 = vld [vmem:[%s1788_s2 + $0x18] sm:$0xff] }
 0x441   :  { %v458_v57 = vpop.f32.mrb[6].mxu1 }
 0x442   :  { %v1353_v59 = vpop.f32.mrb[7].mxu1  ;;  %1359 = vmatmul.mubr.msk.f32.vlgmr.msra.gmra.mrb[2].mxu0 %vm135_vm2, %v458_v57  ;;  %v30_v57 = vld [vmem:[%s1788_s2 + $0x28] sm:$0xff] }
 0x443   :  { %1367 = vmatpush3.xpose.msk.msra.mxu0 %vm135_vm2, %v634_v58  ;;  %1368 = vmatprep.mubr.msk.f32.mxu0 %vm1536_vm1, %v1535_v9  ;;  %v32_v58 = vld [vmem:[%s1788_s2 + $0x38] sm:$0xff] }
 0x444   :  { %1376 = vmatprep.subr.mxu0 %v1535_v9  ;;  %v1438_v59 = vpack.c.bf16 %v32_v58, %v30_v57 }
 0x445   :  { %v627_v61 = vpop.f32.mrb[8].mxu1 }
 0x446   :  { %v628_v62 = vadd.f32 %v627_v61, %v1652_v21  ;;  %v1365_v63 = vpop.f32.mrb[9].mxu1  ;;  %1369 = vmatmul.mubr.msk.f32.vlgmr.msra.gmra.mrb[4].mxu0 %vm135_vm2, %v632_v60 }
 0x447   :  { %1378 = vmatprep.mubr.msk.f32.mxu0 %vm1536_vm1, %v1535_v9 }
 0x448   :  { %v709_v0 = vsel %vm287_vm3, %v628_v62, -inf }
 0x449   :  { %710 = vmax.xlane.f32.xlu1 %v709_v0 }
 0x4d6   :  { %v711_v1 = vpop.xlane.xlu1 %710 }
 0x4d7   :  { %v715_v3 = vsub.f32 %v628_v62, %v711_v1 }
 0x4d9   :  { %v717_v4 = vmul.f32 1.442695, %v715_v3  ;;  %v1005_v3 = vsub.s32 2, %v1618_v11 }
 0x4db   :  { %1491 = vpow2.f32 %v717_v4  ;;  %v1011_v4 = vsub.s32 3, %v1618_v11 }
 0x4e5   :  { %v1492_v7 = vpop.eup %1491 }
 0x4e6   :  { %v721_v10 = vsel %vm287_vm3, %v1492_v7, 0.0 }
 0x4e7   :  { %722 = vadd.xlane.f32.xlu1 %v721_v10 }
 0x519   :  { %v705_v12 = vpop.f32.mrb[4].mxu0 }
 0x51a   :  { %v706_v14 = vadd.f32 %v705_v12, %v1658_v25  ;;  %v1370_v15 = vpop.f32.mrb[5].mxu0 }
 0x51c   :  { %v712_v16 = vsel %vm287_vm3, %v706_v14, -inf }
 0x51d   :  { %713 = vmax.xlane.f32.xlu0 %v712_v16 }
 0x533   :  { %731 = vrot.lane.b32.xlu0 %v1631_v17, %s1542_s13  ;;  %v1478_v17 = vpack.i.bf16 %v1598_v5, %v1589_v2 }
 0x574   :  { %v723_v9 = vpop.xlane.xlu1 %722 }
 0x575   :  { %1493 = vrcp.f32 %v723_v9 }
 0x57f   :  { %v1494_v20 = vpop.eup %1493 }
 0x580   :  { %v729_v23 = vmul.f32 %v1494_v20, %v1492_v7  ;;  %v1006_v7 = vrot.slane %v1628_v13, %v1005_v3 }
 0x5aa   :  { %v714_v19 = vpop.xlane.xlu0 %713 }
 0x5ab   :  { %v716_v21 = vsub.f32 %v706_v14, %v714_v19  ;;  %v1012_v14 = vrot.slane %v1628_v13, %v1011_v4 }
 0x5ad   :  { %v719_v22 = vmul.f32 1.442695, %v716_v21 }
 0x5ae   :  { %v732_v24 = vpop.permute.xlu0 %731 }
 0x5af   :  { %1495 = vpow2.f32 %v719_v22  ;;  %1372 = vmatpush3.msra.mxu1 %v732_v24  ;;  %v33_v22 = vld [vmem:[%s1789_s3] sm:$0xff] }
 0x5b0   :  { %1374 = vmatmul.mubr.msk.f32.vlgmr.msra.gmra.mrb[10].mxu1 %vm287_vm3, %v729_v23  ;;  %v34_v23 = vld [vmem:[%s1789_s3 + $0x8] sm:$0xff] }
 0x5b1   :  { %v1442_v24 = vpack.c.bf16 %v34_v23, %v33_v22 }
 0x5b9   :  { %v1496_v25 = vpop.eup %1495 }
 0x5ba   :  { %v724_v26 = vsel %vm287_vm3, %v1496_v25, 0.0 }
 0x5bb   :  { %725 = vadd.xlane.f32.xlu1 %v724_v26  ;;  %v36_v26 = vld [vmem:[%s1789_s3 + $0x18] sm:$0xff] }
 0x5cc   :  { %807 = vrot.lane.b32.xlu1 %v1634_v18, %s1542_s13 }
 0x5d0   :  { %1479 = vrot.lane.b32.xlu1 %v1478_v17, %s1540_s11 }
 0x648   :  { %v726_v27 = vpop.xlane.xlu1 %725 }
 0x649   :  { %1497 = vrcp.f32 %v726_v27  ;;  %v37_v27 = vld [vmem:[%s1789_s3 + $0x20] sm:$0xff] }
 0x64c   :  { %v808_v28 = vpop.permute.xlu1 %807 }
 0x64d   :  { %1377 = vmatpush3.msra.mxu0 %v808_v28  ;;  %v38_v28 = vld [vmem:[%s1789_s3 + $0x28] sm:$0xff] }
 0x650   :  { %v1480_v31 = vpop.permute.xlu1 %1479 }
 0x651   :  { %v1482_v32 = vunpack.i.h.bf16 %v1480_v31  ;;  %v1481_v33 = vunpack.i.l.bf16 %v1480_v31  ;;  %v40_v31 = vld [vmem:[%s1789_s3 + $0x38] sm:$0xff] }
 0x653   :  { %v1498_v29 = vpop.eup %1497  ;;  %v1430_v34 = vpack.c.bf16 %v1482_v32, %v1481_v33  ;;  %v1017_v33 = vsub.s32 4, %v1618_v11 }
 0x654   :  { %v730_v30 = vmul.f32 %v1498_v29, %v1496_v25  ;;  %v35_v25 = vld [vmem:[%s1789_s3 + $0x10] sm:$0xff]  ;;  %v1450_v29 = vpack.c.bf16 %v38_v28, %v37_v27 }
 0x655   :  { %1431 = vmatprep.subr.bf16.mxu0 %v1430_v34  ;;  %v1446_v17 = vpack.c.bf16 %v36_v26, %v35_v25 }
 0x656   :  { %1379 = vmatmul.mubr.msk.f32.vlgmr.msra.gmra.mrb[6].mxu0 %vm287_vm3, %v730_v30  ;;  %v39_v30 = vld [vmem:[%s1789_s3 + $0x30] sm:$0xff]  ;;  %s1543_s3 = smov [#allocation2]  }
 0x657   :  { %1433 = vmatpush3.bf16.msra.mxu0 %v1430_v34  ;;  %v1454_v32 = vpack.c.bf16 %v40_v31, %v39_v30  ;;  %v1018_v34 = vrot.slane %v1628_v13, %v1017_v33  ;;  %s1244_s10 = sshll.u32 %s1543_s3, 4  ;;  %s1245_s10 = int_to_ptr.vmem [resolvable:$true] %s1244_s10 }
 0x658   :  { %1443 = vmatprep.subr.bf16.mxu0 %v1442_v24  ;;  %s1511_s1 = scalar_lea.vmem %s1245_s10, 256  ;;  %p1516_p1 = scmp.lt.s32.totalorder %s1245_s10, %s1245_s10 }
 0x659   :  { %p1512_p0 = scmp.ne.s32.totalorder %s1245_s10, %s1511_s1  ;;  %p1517_p2 = scmp.lt.s32.totalorder %s1511_s1, %s1511_s1 }
 0x65b   :  { %p1518_p3 = por %p1517_p2, %p1516_p1 }
 0x65d   :  { %p1519_p4 = pnand %p1518_p3, %p1512_p0 }
 0x683   :  { %v803_v18 = vpop.f32.mrb[10].mxu1 }
 0x684   :  { %v1375_v35 = vpop.f32.mrb[11].mxu1  ;;  %1385 = vmatprep.mubr.msk.f32.mxu0 %vm135_vm2, %v803_v18 }
 0x729   :  { %v879_v2 = vpop.f32.mrb[6].mxu0 }
 0x72a   :  { %v1380_v5 = vpop.f32.mrb[7].mxu0  ;;  %1386 = vmatmul.mubr.msk.f32.vlgmr.msra.gmra.mrb[2].mxu0 %vm135_vm2, %v879_v2 }
 0x72b   :  { %1445 = vmatpush3.bf16.msra.mxu0 %v1442_v24 }
 0x72c   :  { %1447 = vmatprep.subr.bf16.mxu0 %v1446_v17 }
 0x72f   :  { %1449 = vmatpush3.bf16.msra.mxu0 %v1446_v17 }
 0x730   :  { %1451 = vmatprep.subr.bf16.mxu0 %v1450_v29 }
 0x733   :  { %1453 = vmatpush3.bf16.msra.mxu0 %v1450_v29 }
 0x734   :  { %1455 = vmatprep.subr.bf16.mxu0 %v1454_v32 }
 0x737   :  { %1457 = vmatpush3.bf16.msra.mxu0 %v1454_v32 }
 0x7fd   :  { %v1387_v38 = vpop.f32.mrb[2].mxu0 }
 0x7fe   :  { %v1458_v39 = vadd.f32 %v1387_v38, %v131_v37  ;;  %v963_v40 = vpop.f32.mrb[3].mxu0 }
 0x7ff   :  { %v1459_v41 = vadd.f32 %v963_v40, %v131_v37 }
 0x800   :  { %v975_v42 = vadd.f32 %v1458_v39, %v1612_v8 }
 0x801   :  { %v974_v43 = vadd.f32 %v1459_v41, %v1603_v6  ;;  %v26_v6 = vld [vmem:[%s1788_s2 + $0x8] sm:$0xff] }
 0x802   :  { %v979_v44 = vsel %vm46_vm0, %v975_v42, 0.0  ;;  %v1434_v56 = vpack.c.bf16 %v28_v55, %v26_v6 }
 0x803   :  { %980 = vadd.xlane.f32.xlu1 %v979_v44  ;;  %v976_v45 = vsel %vm46_vm0, %v974_v43, 0.0 }
 0x804   :  { %977 = vadd.xlane.f32.xlu0 %v976_v45  ;;  %1435 = vmatprep.subr.bf16.mxu1 %v1434_v56 }
 0x805   :  { %1437 = vmatpush3.bf16.msra.mxu1 %v1434_v56 }
 0x806   :  { %1439 = vmatprep.subr.bf16.mxu1 %v1438_v59 }
 0x809   :  { %1441 = vmatpush3.bf16.msra.mxu1 %v1438_v59 }
 0x890   :  { %v981_v46 = vpop.xlane.xlu1 %980 }
 0x891   :  { %v984_v47 = vmul.f32 0.03125, %v981_v46  ;;  %v978_v48 = vpop.xlane.xlu0 %977  ;;  %v1113_v46 = vsub.s32 5, %v1618_v11 }
 0x892   :  { %v983_v49 = vmul.f32 0.03125, %v978_v48 }
 0x893   :  { %v986_v50 = vsub.f32 %v975_v42, %v984_v47  ;;  %v1114_v47 = vrot.slane %v1628_v13, %v1113_v46 }
 0x894   :  { %v985_v51 = vsub.f32 %v974_v43, %v983_v49 }
 0x895   :  { %v988_v54 = vmul.f32 %v986_v50, %v986_v50 }
 0x896   :  { %v987_v52 = vmul.f32 %v985_v51, %v985_v51 }
 0x897   :  { %v992_v8 = vsel %vm46_vm0, %v988_v54, 0.0 }
 0x898   :  { %v989_v53 = vsel %vm46_vm0, %v987_v52, 0.0 }
 0x899   :  { %990 = vadd.xlane.f32.xlu0 %v989_v53 }
 0x89d   :  { %993 = vadd.xlane.f32.xlu0 %v992_v8 }
 0x926   :  { %v991_v60 = vpop.xlane.xlu0 %990 }
 0x927   :  { %v995_v61 = vmul.f32 0.03125, %v991_v60 }
 0x929   :  { %v997_v62 = vadd.f32 1e-12, %v995_v61 }
 0x92a   :  { %v994_v63 = vpop.xlane.xlu0 %993 }
 0x92b   :  { %1499 = vrsqrt.f32 %v997_v62  ;;  %v996_v0 = vmul.f32 0.03125, %v994_v63 }
 0x92d   :  { %v998_v1 = vadd.f32 1e-12, %v996_v0 }
 0x92f   :  { %1501 = vrsqrt.f32 %v998_v1 }
 0x935   :  { %v1500_v10 = vpop.eup %1499 }
 0x936   :  { %v1001_v12 = vmul.f32 %v1500_v10, %v985_v51 }
 0x938   :  { %v1007_v15 = vmul.f32 %v1006_v7, %v1001_v12  ;;  %v1227_v12 = vsub.s32 6, %v1618_v11 }
 0x939   :  { %v1502_v16 = vpop.eup %1501 }
 0x93a   :  { %v1002_v9 = vmul.f32 %v1502_v16, %v986_v50  ;;  %v1013_v19 = vadd.f32 %v1012_v14, %v1007_v15  ;;  %v1228_v15 = vrot.slane %v1628_v13, %v1227_v12 }
 0x93c   :  { %v1008_v20 = vmul.f32 %v1006_v7, %v1002_v9  ;;  %1396 = vmatprep.mubr.msk.f32.mxu1 %vm46_vm0, %v1013_v19 }
 0x93e   :  { %v1014_v21 = vadd.f32 %v1012_v14, %v1008_v20  ;;  %v1233_v14 = vsub.s32 7, %v1618_v11 }
 0x940   :  { %1397 = vmatmul.mubr.msk.f32.vlgmr.msra.gmra.mrb[12].mxu1 %vm46_vm0, %v1014_v21  ;;  %v1234_v20 = vrot.slane %v1628_v13, %v1233_v14 }
 0xa13   :  { %v1398_v18 = vpop.f32.mrb[12].mxu1 }
 0xa14   :  { %v1097_v35 = vadd.f32 %v1398_v18, %v1018_v34  ;;  %v1091_v2 = vpop.f32.mrb[13].mxu1 }
 0xa15   :  { %v1092_v5 = vadd.f32 %v1091_v2, %v1018_v34 }
 0xa16   :  { %v1104_v36 = vmul.f32 0.70710677, %v1097_v35  ;;  %v1101_v43 = vmul.f32 0.5, %v1097_v35 }
 0xa17   :  { %v1103_v37 = vmul.f32 0.70710677, %v1092_v5  ;;  %v1100_v41 = vmul.f32 0.5, %v1092_v5 }
 0xa18   :  { %1503 = verf.f32 %v1104_v36 }
 0xa19   :  { %1505 = verf.f32 %v1103_v37 }
 0xa22   :  { %v1504_v38 = vpop.eup %1503 }
 0xa23   :  { %v1506_v39 = vpop.eup %1505  ;;  %v1108_v40 = vadd.f32 1.0, %v1504_v38 }
 0xa24   :  { %v1107_v42 = vadd.f32 1.0, %v1506_v39 }
 0xa25   :  { %v1110_v45 = vmul.f32 %v1108_v40, %v1101_v43 }
 0xa26   :  { %v1109_v44 = vmul.f32 %v1107_v42, %v1100_v41 }
 0xa28   :  { %1415 = vmatprep.mubr.msk.f32.mxu0 %vm1115_vm4, %v1109_v44 }
 0xa29   :  { %1416 = vmatmul.mubr.msk.f32.vlgmr.msra.gmra.mrb[8].mxu0 %vm1115_vm4, %v1110_v45 }
 0xafc   :  { %v1417_v48 = vpop.f32.mrb[8].mxu0 }
 0xafd   :  { %v1194_v49 = vadd.f32 %v1417_v48, %v1114_v47  ;;  %v1188_v50 = vpop.f32.mrb[9].mxu0 }
 0xafe   :  { %v1189_v51 = vadd.f32 %v1188_v50, %v1114_v47 }
 0xaff   :  { %v1198_v52 = vadd.f32 %v1194_v49, %v1014_v21 }
 0xb00   :  { %v1197_v53 = vadd.f32 %v1189_v51, %v1013_v19 }
 0xb01   :  { %v1202_v54 = vsel %vm46_vm0, %v1198_v52, 0.0 }
 0xb02   :  { %1203 = vadd.xlane.f32.xlu0 %v1202_v54  ;;  %v1199_v8 = vsel %vm46_vm0, %v1197_v53, 0.0 }
 0xb03   :  { %1200 = vadd.xlane.f32.xlu1 %v1199_v8 }
 0xb8f   :  { %v1204_v6 = vpop.xlane.xlu0 %1203 }
 0xb90   :  { %v1206_v55 = vmul.f32 0.03125, %v1204_v6  ;;  %v1201_v56 = vpop.xlane.xlu1 %1200 }
 0xb91   :  { %v1205_v57 = vmul.f32 0.03125, %v1201_v56 }
 0xb92   :  { %v1208_v58 = vsub.f32 %v1198_v52, %v1206_v55 }
 0xb93   :  { %v1207_v59 = vsub.f32 %v1197_v53, %v1205_v57 }
 0xb94   :  { %v1210_v60 = vmul.f32 %v1208_v58, %v1208_v58 }
 0xb95   :  { %v1209_v61 = vmul.f32 %v1207_v59, %v1207_v59 }
 0xb96   :  { %v1214_v62 = vsel %vm46_vm0, %v1210_v60, 0.0 }
 0xb97   :  { %1215 = vadd.xlane.f32.xlu0 %v1214_v62  ;;  %v1211_v63 = vsel %vm46_vm0, %v1209_v61, 0.0 }
 0xb98   :  { %1212 = vadd.xlane.f32.xlu1 %v1211_v63 }
 0xc24   :  { %v1216_v0 = vpop.xlane.xlu0 %1215 }
 0xc25   :  { %v1218_v1 = vmul.f32 0.03125, %v1216_v0  ;;  %v1213_v3 = vpop.xlane.xlu1 %1212 }
 0xc26   :  { %v1217_v4 = vmul.f32 0.03125, %v1213_v3 }
 0xc27   :  { %v1220_v7 = vadd.f32 1e-12, %v1218_v1 }
 0xc28   :  { %v1219_v10 = vadd.f32 1e-12, %v1217_v4 }
 0xc29   :  { %1507 = vrsqrt.f32 %v1220_v7 }
 0xc2a   :  { %1509 = vrsqrt.f32 %v1219_v10 }
 0xc33   :  { %v1508_v16 = vpop.eup %1507 }
 0xc34   :  { %v1510_v9 = vpop.eup %1509  ;;  %v1224_v19 = vmul.f32 %v1508_v16, %v1208_v58 }
 0xc35   :  { %v1223_v21 = vmul.f32 %v1510_v9, %v1207_v59 }
 0xc36   :  { %v1230_v22 = vmul.f32 %v1228_v15, %v1224_v19 }
 0xc37   :  { %v1229_v23 = vmul.f32 %v1228_v15, %v1223_v21 }
 0xc38   :  { %v1236_v24 = vadd.f32 %v1234_v20, %v1230_v22 }
 0xc39   :  { %v1235_v25 = vadd.f32 %v1234_v20, %v1229_v23 }
 0xc3a   :  { %1238 = vst.msk [vmem:[#allocation2 + $0x8] sm:$0xff] %vm46_vm0, %v1236_v24 }
 0xc3b   :  { %1237 = vst.msk [vmem:[#allocation2] sm:$0xff] %vm46_vm0, %v1235_v25 }
 0xc3c   :  { %1522 = shalt.err (!%p1519_p4)
}
 0xc3d   :  { %s1523_s13 = scalar_lea.hbm %s1791_s5, 256 }
 0xc3e   :  { %p1524_p5 = scmp.ne.s32.totalorder %s1791_s5, %s1523_s13  ;;  %p1527_p6 = scmp.lt.u32.totalorder %s1523_s13, %s1791_s5 }
 0xc40   :  { %p1529_p7 = pnand %p1527_p6, %p1524_p5 }
 0xc42   :  { %1532 = shalt.err (!%p1529_p7)
}
 0xc43   :  { %s1544_s18 = smov 128   ;;  %s1545_s19 = smov 8  }
 0xc44   :  { %1250 = dma.vmem_to_hbm [thread:$0]  %s1245_s10, 256, %s1791_s5, [#allocation3], %s1544_s18, %s1544_s18, %s1545_s19  }
 0xc45   :  { %1533 = dma.done.wait [#allocation3], 256  }
 0xc46   :  { %1534 = vsyncadd [#allocation3], 4294967040 }
 0xc47   :  { %1254 = vsyncpa [#allocation3], 1 }

</bundles_post_ra>
